<compile_context>
chip_gen: v7x
topology: tpu7x:2x2x1
jax: 0.10.0
libtpu: 0.0.40
codegen_flags: <defaults>
</compile_context>

<pallas_src>
import functools

import jax
import jax.numpy as jnp
from jax.experimental import pallas as pl
from jax.experimental.pallas import tpu as pltpu

EPS = 1e-5


def _cbn_kernel(x_ref, g_ref, b_ref, o_ref):
    # x_ref : (B, f_blk, T)   channel tile of the input
    # g_ref : (B, f_blk)      gamma tile (precomputed in the wrapper)
    # b_ref : (B, f_blk)      beta  tile (precomputed in the wrapper)
    x = x_ref[...].astype(jnp.float32)
    B, f_blk, T = x.shape
    inv_n = 1.0 / float(B * T)

    # BatchNorm1d (affine=False, training mode): per-channel stats over (B, T),
    # biased variance, eps = 1e-5.  Centered form avoids catastrophic cancellation.
    mean = jnp.sum(x, axis=(0, 2), keepdims=True) * inv_n          # (1, f_blk, 1)
    xc = x - mean
    var = jnp.sum(xc * xc, axis=(0, 2), keepdims=True) * inv_n     # (1, f_blk, 1)
    inv_std = jax.lax.rsqrt(var + EPS)                             # EUP

    gamma = g_ref[...].astype(jnp.float32)[:, :, None]             # (B, f_blk, 1)
    beta = b_ref[...].astype(jnp.float32)[:, :, None]              # (B, f_blk, 1)
    scale = gamma * inv_std                                        # (B, f_blk, 1)

    o_ref[...] = (scale * xc + beta).astype(o_ref.dtype)


def _vmem_budget_bytes():
    """Scoped VMEM limit to request, derived from the chip (v7x has 64 MiB)."""
    try:
        cap = int(pltpu.get_tpu_info().vmem_capacity_bytes)
    except Exception:
        cap = 64 << 20  # conservative fallback (v7x per-TensorCore VMEM)
    return min(int(cap * 0.75), 96 << 20)


def _pick_f_blk(B, F, T, itemsize, vmem_limit_bytes):
    """Largest legal channel tile whose pipelined buffers fit the VMEM budget."""
    # Double-buffered input + output tiles: 2 * (x_tile + out_tile)
    #   = 4 * B * f_blk * T * itemsize bytes.  Keep within ~70% of the budget
    # (headroom for gamma/beta tiles and compiler scratch).
    bytes_per_chan = 4 * B * T * itemsize
    cap = max(1, int(vmem_limit_bytes * 0.7) // max(1, bytes_per_chan))

    # Candidates: multiples of 128 dividing F (lane-dense (B, f_blk) gamma/beta
    # blocks and sublane-aligned x blocks).  Prefer the largest one that still
    # leaves >= 2 grid steps so the "parallel" axis can shard across v7x's 2 TCs.
    best = None
    d = 128
    while d <= min(F, cap):
        if F % d == 0 and (d < F or best is None):
            best = d
        d += 128
    if best is not None:
        return best
    # Small F (or F not 128-divisible): single full-channel block is always legal.
    return F


@functools.partial(jax.jit, static_argnames=("f_blk", "vmem_limit"))
def _cbn_jit(x, c, wg, bg, wb, bb, *, f_blk, vmem_limit):
    B, F, T = x.shape

    # Hoisted 1x1 convs (per-sample linear maps), biases folded here.
    gamma = (c.astype(jnp.float32) @ wg.astype(jnp.float32).T
             + bg.astype(jnp.float32)[None, :])                    # (B, F)
    beta = (c.astype(jnp.float32) @ wb.astype(jnp.float32).T
            + bb.astype(jnp.float32)[None, :])                     # (B, F)

    grid = (F // f_blk,)
    return pl.pallas_call(
        _cbn_kernel,
        out_shape=jax.ShapeDtypeStruct((B, F, T), x.dtype),
        grid_spec=pltpu.PrefetchScalarGridSpec(
            num_scalar_prefetch=0,
            grid=grid,
            in_specs=[
                pl.BlockSpec((B, f_blk, T), lambda f: (0, f, 0)),  # x tile
                pl.BlockSpec((B, f_blk), lambda f: (0, f)),        # gamma tile
                pl.BlockSpec((B, f_blk), lambda f: (0, f)),        # beta tile
            ],
            out_specs=pl.BlockSpec((B, f_blk, T), lambda f: (0, f, 0)),
        ),
        compiler_params=pltpu.CompilerParams(
            dimension_semantics=("parallel",),
            vmem_limit_bytes=vmem_limit,
        ),
    )(x, gamma, beta)


def cbatchnorm1d(x, c, wg, bg, wb, bb, *, f_blk=None):
    """x: (B, F, T), c: (B, C), wg/wb: (F, C) = conv weight[:, :, 0], bg/bb: (F,)."""
    B, F, T = x.shape
    assert c.shape[0] == B and wg.shape[0] == F and wb.shape[0] == F
    vmem_limit = _vmem_budget_bytes()
    if f_blk is None:
        f_blk = _pick_f_blk(B, F, T, jnp.dtype(x.dtype).itemsize, vmem_limit)
    assert F % f_blk == 0
    return _cbn_jit(x, c, wg, bg, wb, bb, f_blk=f_blk, vmem_limit=vmem_limit)


def reference(x, c, wg, bg, wb, bb):
    gamma = c @ wg.T + bg[None, :]                                 # (B, F)
    beta = c @ wb.T + bb[None, :]                                  # (B, F)
    mean = x.mean(axis=(0, 2), keepdims=True)
    var = ((x - mean) ** 2).mean(axis=(0, 2), keepdims=True)       # biased, as in torch BN
    net = (x - mean) / jnp.sqrt(var + EPS)
    return gamma[:, :, None] * net + beta[:, :, None]


if __name__ == "__main__":
    # Small shapes consistent with the module's forward: x: (B, f_dim, T), c: (B, c_dim).
    # T = 128 keeps the output tile lane-dense even at test scale.
    B, C_DIM, F_DIM, T = 2, 8, 32, 128

    key = jax.random.PRNGKey(0)
    kx, kc, kwg, kbg, kwb, kbb = jax.random.split(key, 6)

    x = jax.random.normal(kx, (B, F_DIM, T), dtype=jnp.float32)
    c = jax.random.normal(kc, (B, C_DIM), dtype=jnp.float32)

    # Deterministic parameter init.  NOTE: the module's reset_parameters() zeroes the
    # conv weights (gamma==1, beta==0); we use small random values so the conditional
    # path is actually exercised.
    wg = 0.1 * jax.random.normal(kwg, (F_DIM, C_DIM), dtype=jnp.float32)   # conv_gamma.weight[:, :, 0]
    bg = 1.0 + 0.1 * jax.random.normal(kbg, (F_DIM,), dtype=jnp.float32)   # conv_gamma.bias
    wb = 0.1 * jax.random.normal(kwb, (F_DIM, C_DIM), dtype=jnp.float32)   # conv_beta.weight[:, :, 0]
    bb = 0.1 * jax.random.normal(kbb, (F_DIM,), dtype=jnp.float32)         # conv_beta.bias

    out = cbatchnorm1d(x, c, wg, bg, wb, bb)
    out = jax.block_until_ready(out)

    ref = reference(x, c, wg, bg, wb, bb)
    assert out.shape == (B, F_DIM, T)
    assert jnp.allclose(out, ref, atol=1e-4, rtol=1e-4), (
        f"max abs err = {jnp.max(jnp.abs(out - ref))}"
    )

    print("KERNEL_OK")
</pallas_src>

<mosaic_0001>
module attributes {stable_mosaic.version = 11 : i64} {
  func.func @_cbn_kernel(%arg0: i32, %arg1: memref<2x32x128xf32, #tpu.memory_space<vmem>>, %arg2: memref<2x32xf32, #tpu.memory_space<vmem>>, %arg3: memref<2x32xf32, #tpu.memory_space<vmem>>, %arg4: memref<2x32x128xf32, #tpu.memory_space<vmem>>) attributes {dimension_semantics = [#tpu.dimension_semantics<parallel>], iteration_bounds = array<i64: 1>, scalar_prefetch = 0 : i64, scratch_operands = 0 : i64, tpu.core_type = #tpu.core_type<tc>, window_params = [{transform_indices = @transform_0, window_bounds = array<i64: 2, 32, 128>}, {transform_indices = @transform_1, window_bounds = array<i64: 2, 32>}, {transform_indices = @transform_2, window_bounds = array<i64: 2, 32>}, {transform_indices = @transform_3, window_bounds = array<i64: 2, 32, 128>}]} {
    %c0 = arith.constant 0 : index
    %c0_0 = arith.constant 0 : index
    %c0_1 = arith.constant 0 : index
    %0 = vector.load %arg1[%c0, %c0_0, %c0_1] : memref<2x32x128xf32, #tpu.memory_space<vmem>>, vector<2x32x128xf32>
    %cst = arith.constant dense<0.000000e+00> : vector<32xf32>
    %1 = vector.multi_reduction <add>, %0, %cst [0, 2] : vector<2x32x128xf32> to vector<32xf32>
    %2 = vector.shape_cast %1 : vector<32xf32> to vector<1x32x1xf32>
    %cst_2 = arith.constant 3.906250e-03 : f32
    %3 = vector.broadcast %cst_2 : f32 to vector<1x32x1xf32>
    %4 = arith.mulf %2, %3 : vector<1x32x1xf32>
    %5 = vector.broadcast %4 : vector<1x32x1xf32> to vector<2x32x128xf32>
    %6 = arith.subf %0, %5 : vector<2x32x128xf32>
    %7 = arith.mulf %6, %6 : vector<2x32x128xf32>
    %cst_3 = arith.constant dense<0.000000e+00> : vector<32xf32>
    %8 = vector.multi_reduction <add>, %7, %cst_3 [0, 2] : vector<2x32x128xf32> to vector<32xf32>
    %9 = vector.shape_cast %8 : vector<32xf32> to vector<1x32x1xf32>
    %cst_4 = arith.constant 3.906250e-03 : f32
    %10 = vector.broadcast %cst_4 : f32 to vector<1x32x1xf32>
    %11 = arith.mulf %9, %10 : vector<1x32x1xf32>
    %cst_5 = arith.constant 9.99999974E-6 : f32
    %12 = vector.broadcast %cst_5 : f32 to vector<1x32x1xf32>
    %13 = arith.addf %11, %12 : vector<1x32x1xf32>
    %14 = math.rsqrt %13 : vector<1x32x1xf32>
    %c0_6 = arith.constant 0 : index
    %c0_7 = arith.constant 0 : index
    %15 = vector.load %arg2[%c0_6, %c0_7] : memref<2x32xf32, #tpu.memory_space<vmem>>, vector<2x32xf32>
    %16 = vector.shape_cast %15 : vector<2x32xf32> to vector<2x32x1xf32>
    %c0_8 = arith.constant 0 : index
    %c0_9 = arith.constant 0 : index
    %17 = vector.load %arg3[%c0_8, %c0_9] : memref<2x32xf32, #tpu.memory_space<vmem>>, vector<2x32xf32>
    %18 = vector.shape_cast %17 : vector<2x32xf32> to vector<2x32x1xf32>
    %19 = vector.broadcast %14 : vector<1x32x1xf32> to vector<2x32x1xf32>
    %20 = arith.mulf %16, %19 : vector<2x32x1xf32>
    %21 = vector.broadcast %20 : vector<2x32x1xf32> to vector<2x32x128xf32>
    %22 = arith.mulf %21, %6 : vector<2x32x128xf32>
    %23 = vector.broadcast %18 : vector<2x32x1xf32> to vector<2x32x128xf32>
    %24 = arith.addf %22, %23 : vector<2x32x128xf32>
    %c0_10 = arith.constant 0 : index
    %c0_11 = arith.constant 0 : index
    %c0_12 = arith.constant 0 : index
    %25 = vector.load %arg4[%c0_10, %c0_11, %c0_12] : memref<2x32x128xf32, #tpu.memory_space<vmem>>, vector<2x32x128xf32>
    tpu.vector_store %arg4[%c0_10, %c0_11, %c0_12], %24 {strides = array<i32>} : memref<2x32x128xf32, #tpu.memory_space<vmem>>, vector<2x32x128xf32>,
    return
  }
  func.func @transform_0(%arg0: i32) -> (i32, i32, i32) {
    %c0_i32 = arith.constant 0 : i32
    %c0_i32_0 = arith.constant 0 : i32
    %c0_i32_1 = arith.constant 0 : i32
    return %c0_i32, %arg0, %c0_i32_0 : i32, i32, i32
  }
  func.func @transform_1(%arg0: i32) -> (i32, i32) {
    %c0_i32 = arith.constant 0 : i32
    %c0_i32_0 = arith.constant 0 : i32
    return %c0_i32, %arg0 : i32, i32
  }
  func.func @transform_2(%arg0: i32) -> (i32, i32) {
    %c0_i32 = arith.constant 0 : i32
    %c0_i32_0 = arith.constant 0 : i32
    return %c0_i32, %arg0 : i32, i32
  }
  func.func @transform_3(%arg0: i32) -> (i32, i32, i32) {
    %c0_i32 = arith.constant 0 : i32
    %c0_i32_0 = arith.constant 0 : i32
    %c0_i32_1 = arith.constant 0 : i32
    return %c0_i32, %arg0, %c0_i32_0 : i32, i32, i32
  }
}

</mosaic_0001>

<bundles_post_ra>
// kernel: _cbn_jit.1
= control target key start
LH: loop header
LB: loop body
LE: loop exit
PB: predicated region body
PF: predicated region fallthrough
CT: control target
= control target key end

     0   :  { %8 = vsyncpa [#allocation3], 0  ;;  %s360_s0 = inlined_call_operand.hbm [shape: f32[2,32,128], index: 0, kind: input, shape index: {}]   ;;  %s361_s1 = inlined_call_operand.vmem [shape: f32[2,32], index: 1, kind: input, shape index: {}]   ;;  %s362_s2 = inlined_call_operand.vmem [shape: f32[2,32], index: 2, kind: input, shape index: {}]   ;;  %s363_s3 = inlined_call_operand.hbm [shape: f32[2,32,128], index: 3, kind: output, shape index: {}]  }
   0x1   :  { %9 = vsyncpa [#allocation4], 0  ;;  %s280_s12 = smov [#allocation2]   ;;  %s232_s16 = scalar_lea.hbm %s360_s0, 1024 }
   0x2   :  { %s15_s13 = sshll.u32 %s280_s12, 4  ;;  %p233_p0 = scmp.ne.s32.totalorder %s360_s0, %s232_s16  ;;  %s16_s13 = int_to_ptr.vmem [resolvable:$true] %s15_s13 }
   0x3   :  { %p236_p1 = scmp.lt.u32.totalorder %s232_s16, %s360_s0 }
   0x5   :  { %p238_p2 = pnand %p236_p1, %p233_p0 }
   0x7   :  { %241 = shalt.err (!%p238_p2)
}
   0x8   :  { %s242_s21 = scalar_lea.vmem %s16_s13, 1024  ;;  %p247_p4 = scmp.lt.s32.totalorder %s16_s13, %s16_s13 }
   0x9   :  { %p243_p3 = scmp.ne.s32.totalorder %s16_s13, %s242_s21  ;;  %p248_p5 = scmp.lt.s32.totalorder %s242_s21, %s242_s21 }
   0xb   :  { %p249_p6 = por %p248_p5, %p247_p4 }
   0xd   :  { %p250_p7 = pnand %p249_p6, %p243_p3 }
   0xf   :  { %253 = shalt.err (!%p250_p7)
}
  0x10   :  { %s281_s22 = smov 128   ;;  %s282_s23 = smov 8  }
  0x11   :  { %21 = dma.hbm_to_vmem [thread:$0]  %s360_s0, 1024, %s16_s13, [#allocation3], %s281_s22, %s281_s22, %s282_s23  }
  0x12   :  { %276 = dma.done.wait [#allocation3], 1024  }
  0x13   :  { %277 = vsyncadd [#allocation3], 4294966272  ;;  %v29_v0 = vld [vmem:[#allocation2] sm:$0xff]  ;;  %v31_v2 = vld [vmem:[#allocation2 + $0x10] sm:$0xff]  ;;  %v94_v12 = vlaneseq }
  0x14   :  { %v33_v1 = vld [vmem:[#allocation2 + $0x20] sm:$0xff]  ;;  %v35_v4 = vld [vmem:[#allocation2 + $0x30] sm:$0xff]  ;;  %v30_v5 = vld [vmem:[#allocation2 + $0x8] sm:$0xff] }
  0x15   :  { %v37_v3 = vadd.f32 %v33_v1, %v29_v0  ;;  %v34_v6 = vld [vmem:[#allocation2 + $0x28] sm:$0xff]  ;;  %v43_v7 = vadd.f32 %v35_v4, %v31_v2  ;;  %v32_v8 = vld [vmem:[#allocation2 + $0x18] sm:$0xff]  ;;  %v95_v13 = vshrl.u32 %v94_v12, 7  ;;  %v93_v15 = vld [vmem:[%s361_s1] sm:$0x3]  ;;  %s283_s1 = smov [#allocation5]  }
  0x16   :  { %v36_v9 = vld [vmem:[#allocation2 + $0x38] sm:$0xff]  ;;  %v40_v10 = vadd.f32 %v34_v6, %v30_v5  ;;  %v132_v18 = vld [vmem:[%s362_s2] sm:$0x3]  ;;  %s208_s2 = sshll.u32 %s283_s1, 4  ;;  %s209_s2 = int_to_ptr.vmem [resolvable:$true] %s208_s2 }
  0x17   :  { %38 = vadd.xlane.f32.xlu0 %v37_v3  ;;  %44 = vadd.xlane.f32.xlu1 %v43_v7  ;;  %v46_v11 = vadd.f32 %v36_v9, %v32_v8  ;;  %v96_v14 = vsub.s32 0, %v95_v13  ;;  %v115_v17 = vsub.s32 1, %v95_v13  ;;  %s254_s29 = scalar_lea.vmem %s209_s2, 1024  ;;  %p259_p9 = scmp.lt.s32.totalorder %s209_s2, %s209_s2 }
  0x18   :  { %p255_p8 = scmp.ne.s32.totalorder %s209_s2, %s254_s29  ;;  %p260_p10 = scmp.lt.s32.totalorder %s254_s29, %s254_s29 }
  0x19   :  { %v97_v16 = vrot.slane %v93_v15, %v96_v14  ;;  %v116_v19 = vrot.slane %v93_v15, %v115_v17  ;;  %v155_v20 = vrot.slane %v132_v18, %v115_v17  ;;  %v136_v21 = vrot.slane %v132_v18, %v96_v14 }
  0x1a   :  { %p261_p11 = por %p260_p10, %p259_p9 }
  0x1b   :  { %41 = vadd.xlane.f32.xlu0 %v40_v10  ;;  %47 = vadd.xlane.f32.xlu1 %v46_v11 }
  0x1c   :  { %p262_p12 = pnand %p261_p11, %p255_p8 }
  0x2c   :  { %103 = vbcast.lane.b32.xlu1 %v97_v16, 264 }
  0x30   :  { %107 = vbcast.lane.b32.xlu1 %v97_v16, 272 }
  0x31   :  { %99 = vbcast.lane.b32.xlu0 %v97_v16, 256 }
  0x34   :  { %111 = vbcast.lane.b32.xlu1 %v97_v16, 280 }
  0x35   :  { %118 = vbcast.lane.b32.xlu0 %v116_v19, 256 }
  0x38   :  { %122 = vbcast.lane.b32.xlu1 %v116_v19, 264 }
  0x39   :  { %126 = vbcast.lane.b32.xlu0 %v116_v19, 272 }
  0x3c   :  { %130 = vbcast.lane.b32.xlu1 %v116_v19, 280 }
  0x3d   :  { %138 = vbcast.lane.b32.xlu0 %v136_v21, 256 }
  0x40   :  { %142 = vbcast.lane.b32.xlu1 %v136_v21, 264 }
  0x41   :  { %146 = vbcast.lane.b32.xlu0 %v136_v21, 272 }
  0x44   :  { %150 = vbcast.lane.b32.xlu1 %v136_v21, 280 }
  0xa4   :  { %v39_v22 = vpop.xlane.xlu0 %38  ;;  %v45_v24 = vpop.xlane.xlu1 %44 }
  0xa5   :  { %v49_v23 = vmul.f32 0.00390625, %v39_v22  ;;  %v51_v25 = vmul.f32 0.00390625, %v45_v24 }
  0xa7   :  { %v53_v26 = vsub.f32 %v29_v0, %v49_v23  ;;  %v57_v27 = vsub.f32 %v33_v1, %v49_v23  ;;  %v325_v28 = vsub.f32 %v31_v2, %v51_v25  ;;  %v327_v29 = vsub.f32 %v35_v4, %v51_v25 }
  0xa8   :  { %v42_v30 = vpop.xlane.xlu0 %41  ;;  %v48_v43 = vpop.xlane.xlu1 %47 }
  0xa9   :  { %v50_v31 = vmul.f32 0.00390625, %v42_v30  ;;  %v61_v32 = vmul.f32 %v53_v26, %v53_v26  ;;  %v65_v33 = vmul.f32 %v57_v27, %v57_v27  ;;  %v63_v34 = vmul.f32 %v325_v28, %v325_v28 }
  0xaa   :  { %v67_v35 = vmul.f32 %v327_v29, %v327_v29  ;;  %v52_v44 = vmul.f32 0.00390625, %v48_v43 }
  0xab   :  { %v54_v36 = vsub.f32 %v30_v5, %v50_v31  ;;  %v58_v37 = vsub.f32 %v34_v6, %v50_v31  ;;  %v69_v38 = vadd.f32 %v65_v33, %v61_v32 }
  0xac   :  { %v75_v39 = vadd.f32 %v67_v35, %v63_v34  ;;  %v333_v45 = vsub.f32 %v32_v8, %v52_v44  ;;  %v335_v46 = vsub.f32 %v36_v9, %v52_v44  ;;  %v104_v50 = vpop.permute.xlu1 %103  ;;  %v100_v52 = vpop.permute.xlu0 %99 }
  0xad   :  { %70 = vadd.xlane.f32.xlu0 %v69_v38  ;;  %v62_v40 = vmul.f32 %v54_v36, %v54_v36  ;;  %v66_v41 = vmul.f32 %v58_v37, %v58_v37 }
  0xae   :  { %v64_v47 = vmul.f32 %v333_v45, %v333_v45  ;;  %v68_v48 = vmul.f32 %v335_v46, %v335_v46 }
  0xaf   :  { %v72_v42 = vadd.f32 %v66_v41, %v62_v40 }
  0xb0   :  { %v78_v49 = vadd.f32 %v68_v48, %v64_v47  ;;  %v108_v51 = vpop.permute.xlu1 %107  ;;  %v119_v54 = vpop.permute.xlu0 %118 }
  0xb1   :  { %76 = vadd.xlane.f32.xlu0 %v75_v39  ;;  %73 = vadd.xlane.f32.xlu1 %v72_v42 }
  0xb4   :  { %v112_v53 = vpop.permute.xlu1 %111  ;;  %v127_v56 = vpop.permute.xlu0 %126 }
  0xb8   :  { %v123_v55 = vpop.permute.xlu1 %122  ;;  %v139_v58 = vpop.permute.xlu0 %138 }
  0xbc   :  { %v131_v57 = vpop.permute.xlu1 %130  ;;  %v147_v60 = vpop.permute.xlu0 %146 }
  0xc0   :  { %v143_v59 = vpop.permute.xlu1 %142 }
  0xc2   :  { %161 = vbcast.lane.b32.xlu1 %v155_v20, 264 }
  0xc4   :  { %v151_v61 = vpop.permute.xlu1 %150 }
  0xc7   :  { %157 = vbcast.lane.b32.xlu0 %v155_v20, 256 }
  0xcb   :  { %165 = vbcast.lane.b32.xlu0 %v155_v20, 272 }
  0xe6   :  { %79 = vadd.xlane.f32.xlu1 %v78_v49 }
  0xf7   :  { %169 = vbcast.lane.b32.xlu1 %v155_v20, 280 }
 0x13a   :  { %v71_v62 = vpop.xlane.xlu0 %70 }
 0x13b   :  { %v81_v63 = vmul.f32 0.00390625, %v71_v62 }
 0x13d   :  { %v85_v0 = vadd.f32 1e-05, %v81_v63 }
 0x13e   :  { %v74_v1 = vpop.xlane.xlu1 %73  ;;  %v77_v2 = vpop.xlane.xlu0 %76 }
 0x13f   :  { %224 = vrsqrt.f32 %v85_v0  ;;  %v82_v3 = vmul.f32 0.00390625, %v74_v1  ;;  %v83_v4 = vmul.f32 0.00390625, %v77_v2 }
 0x141   :  { %v86_v5 = vadd.f32 1e-05, %v82_v3  ;;  %v87_v6 = vadd.f32 1e-05, %v83_v4 }
 0x142   :  { %v158_v10 = vpop.permute.xlu0 %157  ;;  %v162_v25 = vpop.permute.xlu1 %161 }
 0x143   :  { %226 = vrsqrt.f32 %v86_v5 }
 0x144   :  { %228 = vrsqrt.f32 %v87_v6 }
 0x146   :  { %v166_v23 = vpop.permute.xlu0 %165 }
 0x149   :  { %v225_v7 = vpop.eup %224 }
 0x14a   :  { %v171_v8 = vmul.f32 %v225_v7, %v100_v52  ;;  %v175_v9 = vmul.f32 %v225_v7, %v119_v54 }
 0x14c   :  { %v179_v11 = vmul.f32 %v171_v8, %v53_v26  ;;  %v183_v12 = vmul.f32 %v175_v9, %v57_v27 }
 0x14d   :  { %v227_v13 = vpop.eup %226 }
 0x14e   :  { %v229_v14 = vpop.eup %228  ;;  %v187_v15 = vadd.f32 %v179_v11, %v139_v58  ;;  %v172_v16 = vmul.f32 %v227_v13, %v104_v50  ;;  %v176_v17 = vmul.f32 %v227_v13, %v123_v55  ;;  %v191_v18 = vadd.f32 %v183_v12, %v158_v10 }
 0x14f   :  { %v173_v19 = vmul.f32 %v229_v14, %v108_v51  ;;  %v177_v20 = vmul.f32 %v229_v14, %v127_v56 }
 0x150   :  { %195 = vst [vmem:[#allocation5] sm:$0xff] %v187_v15  ;;  %v180_v21 = vmul.f32 %v172_v16, %v54_v36  ;;  %v184_v22 = vmul.f32 %v176_v17, %v58_v37  ;;  %199 = vst [vmem:[#allocation5 + $0x20] sm:$0xff] %v191_v18 }
 0x151   :  { %v181_v24 = vmul.f32 %v173_v19, %v325_v28  ;;  %v185_v30 = vmul.f32 %v177_v20, %v327_v29 }
 0x152   :  { %v188_v26 = vadd.f32 %v180_v21, %v143_v59  ;;  %v192_v27 = vadd.f32 %v184_v22, %v162_v25 }
 0x153   :  { %v189_v31 = vadd.f32 %v181_v24, %v147_v60  ;;  %v193_v32 = vadd.f32 %v185_v30, %v166_v23 }
 0x154   :  { %196 = vst [vmem:[#allocation5 + $0x8] sm:$0xff] %v188_v26  ;;  %200 = vst [vmem:[#allocation5 + $0x28] sm:$0xff] %v192_v27 }
 0x155   :  { %197 = vst [vmem:[#allocation5 + $0x10] sm:$0xff] %v189_v31  ;;  %201 = vst [vmem:[#allocation5 + $0x30] sm:$0xff] %v193_v32 }
 0x173   :  { %v80_v33 = vpop.xlane.xlu1 %79 }
 0x174   :  { %v84_v34 = vmul.f32 0.00390625, %v80_v33 }
 0x176   :  { %v88_v35 = vadd.f32 1e-05, %v84_v34 }
 0x177   :  { %v170_v39 = vpop.permute.xlu1 %169 }
 0x178   :  { %230 = vrsqrt.f32 %v88_v35 }
 0x182   :  { %v231_v36 = vpop.eup %230 }
 0x183   :  { %v174_v37 = vmul.f32 %v231_v36, %v112_v53  ;;  %v178_v38 = vmul.f32 %v231_v36, %v131_v57 }
 0x185   :  { %v182_v28 = vmul.f32 %v174_v37, %v333_v45  ;;  %v186_v29 = vmul.f32 %v178_v38, %v335_v46 }
 0x187   :  { %v190_v40 = vadd.f32 %v182_v28, %v151_v61  ;;  %v194_v41 = vadd.f32 %v186_v29, %v170_v39 }
 0x189   :  { %198 = vst [vmem:[#allocation5 + $0x18] sm:$0xff] %v190_v40  ;;  %202 = vst [vmem:[#allocation5 + $0x38] sm:$0xff] %v194_v41 }
 0x18a   :  { %265 = shalt.err (!%p262_p12)
}
 0x18b   :  { %s266_s5 = scalar_lea.hbm %s363_s3, 1024 }
 0x18c   :  { %p267_p13 = scmp.ne.s32.totalorder %s363_s3, %s266_s5  ;;  %p270_p0 = scmp.lt.u32.totalorder %s266_s5, %s363_s3 }
 0x18e   :  { %p272_p1 = pnand %p270_p0, %p267_p13 }
 0x190   :  { %275 = shalt.err (!%p272_p1)
}
 0x191   :  { %214 = dma.vmem_to_hbm [thread:$0]  %s209_s2, 1024, %s363_s3, [#allocation4], %s281_s22, %s281_s22, %s282_s23  }
 0x192   :  { %278 = dma.done.wait [#allocation4], 1024  }
 0x193   :  { %279 = vsyncadd [#allocation4], 4294966272 }
 0x194   :  { %218 = vsyncpa [#allocation3], 1 }
 0x195   :  { %219 = vsyncpa [#allocation4], 1 }

</bundles_post_ra>
